<compile_context>
chip_gen: v7x
topology: tpu7x:2x2x1
jax: 0.10.0
libtpu: 0.0.40
codegen_flags: <defaults>
</compile_context>

<pallas_src>
import math

import jax
import jax.numpy as jnp
from jax.experimental import pallas as pl
from jax.experimental.pallas import tpu as pltpu


def _round_up(x, m):
    return ((x + m - 1) // m) * m


def _lcm(a, b):
    return a * b // math.gcd(a, b)


def nbnorm_kernel(x_ref, w_ref, b_ref, n_ref, p_ref):
    # x_ref: (TG, S*c_in)          -- S m-positions interleaved along lanes
    # w_ref: (S*c_in, 2*S*c_out)   -- [kron(I_S, Wn) | kron(I_S, Wp)]
    # b_ref: (1, 2*S*c_out)
    # n_ref / p_ref: (TG, S*c_out) -- lane-dense, un-interleaves to (M, c_out)
    lh = n_ref.shape[1]
    z = jnp.dot(x_ref[...], w_ref[...],
                preferred_element_type=jnp.float32) + b_ref[...]
    zn = z[:, :lh]          # 128-aligned lane slices: no relayout
    zp = z[:, lh:]
    # softplus (numerically stable, matches F.softplus / logaddexp(z, 0))
    n_ref[...] = (jnp.maximum(zn, 0.0)
                  + jnp.log(1.0 + jnp.exp(-jnp.abs(zn)))).astype(n_ref.dtype)
    # sigmoid via tanh: one EUP op, stable for all z
    p_ref[...] = (0.5 * jnp.tanh(0.5 * zp) + 0.5).astype(p_ref.dtype)


def nbnorm_forward(x, wn, bn, wp, bp, *, tm=65536, out_dtype=jnp.float32):
    """x: (B, N, c_in, 1).  wn/wp: (c_in, c_out), bn/bp: (c_out,).
    Returns (n, p), each (B, N, c_out) -- matches NBNorm.forward."""
    B, N, c_in, one = x.shape
    assert one == 1
    c_out = wn.shape[1]
    M = B * N

    # Interleave factor: S consecutive m-positions share one lane row, chosen
    # so both the input lane width (S*c_in) and each output half (S*c_out)
    # are multiples of 128 -> fully dense DMAs and stores.
    S = _lcm(128 // math.gcd(128, c_in), 128 // math.gcd(128, c_out))
    lin, lh = S * c_in, S * c_out

    x2 = x.reshape(M, c_in).astype(jnp.float32)       # free view
    Mpad = _round_up(M, S)
    if Mpad != M:
        # TODO(synk): tiny pad copy only when B*N % S != 0; a manual-DMA edge
        # path could avoid even this single extra pass over x.
        x2 = jnp.pad(x2, ((0, Mpad - M), (0, 0)))
    Mg = Mpad // S
    xg = x2.reshape(Mg, lin)                          # free view (interleave)

    # Block-diagonal fused weights / biases (tiny, built once per call).
    eye = jnp.eye(S, dtype=jnp.float32)
    w_big = jnp.concatenate(
        [jnp.kron(eye, wn.astype(jnp.float32)),
         jnp.kron(eye, wp.astype(jnp.float32))], axis=1)            # (lin, 2*lh)
    b_big = jnp.concatenate(
        [jnp.tile(bn.astype(jnp.float32), S),
         jnp.tile(bp.astype(jnp.float32), S)]).reshape(1, 2 * lh)

    # Tile the row-group axis.
    if Mg <= 8:
        tg = Mg                                        # single block == full dim
    else:
        tg_cap = max(8, (max(tm, S) // S) // 8 * 8)    # from tm (in m units)
        tg_8steps = _round_up(pl.cdiv(Mg, 8), 8)       # aim for >= ~8 grid steps
        tg = max(8, min(tg_cap, tg_8steps))
        # Keep the double-buffered working set under ~12 MiB so it fits the
        # default scoped-VMEM limit on every generation (incl. v7x).
        bytes_per_group = 2 * 4 * (lin + 2 * lh)
        tg = max(8, min(tg, ((12 << 20) // bytes_per_group) // 8 * 8))
    grid = (pl.cdiv(Mg, tg),)

    cost = pl.CostEstimate(
        flops=2 * Mg * lin * 2 * lh,
        transcendentals=3 * Mpad * 2 * c_out,
        bytes_accessed=4 * (Mg * lin + 2 * Mg * lh + lin * 2 * lh + 2 * lh),
    )

    n_g, p_g = pl.pallas_call(
        nbnorm_kernel,
        out_shape=(jax.ShapeDtypeStruct((Mg, lh), out_dtype),
                   jax.ShapeDtypeStruct((Mg, lh), out_dtype)),
        grid_spec=pltpu.PrefetchScalarGridSpec(
            num_scalar_prefetch=0,
            grid=grid,
            in_specs=[
                pl.BlockSpec((tg, lin), lambda i: (i, 0)),
                pl.BlockSpec((lin, 2 * lh), lambda i: (0, 0)),   # fetched once
                pl.BlockSpec((1, 2 * lh), lambda i: (0, 0)),     # fetched once
            ],
            out_specs=[
                pl.BlockSpec((tg, lh), lambda i: (i, 0)),
                pl.BlockSpec((tg, lh), lambda i: (i, 0)),
            ],
        ),
        compiler_params=pltpu.CompilerParams(
            dimension_semantics=("parallel",)),
        cost_estimate=cost,
    )(xg, w_big, b_big)

    # Free un-interleave: (Mg, S*c_out) row-major == (Mpad, c_out).
    n = n_g.reshape(Mpad, c_out)[:M].reshape(B, N, c_out)
    p = p_g.reshape(Mpad, c_out)[:M].reshape(B, N, c_out)
    return n, p


def init_params(key, c_in, c_out):
    """Deterministic init mimicking nn.Conv2d default (uniform +-1/sqrt(fan_in))."""
    k_wn, k_bn, k_wp, k_bp = jax.random.split(key, 4)
    bound = 1.0 / math.sqrt(c_in)
    wn = jax.random.uniform(k_wn, (c_in, c_out), jnp.float32, -bound, bound)
    bn = jax.random.uniform(k_bn, (c_out,), jnp.float32, -bound, bound)
    wp = jax.random.uniform(k_wp, (c_in, c_out), jnp.float32, -bound, bound)
    bp = jax.random.uniform(k_bp, (c_out,), jnp.float32, -bound, bound)
    return wn, bn, wp, bp


def nbnorm_reference(x, wn, bn, wp, bp):
    """Pure-JAX reference (mirrors the PyTorch forward)."""
    B, N, c_in, _ = x.shape
    xm = x.reshape(B, N, c_in)
    n = jnp.einsum("bni,io->bno", xm, wn) + bn
    p = jnp.einsum("bni,io->bno", xm, wp) + bp
    return jnp.logaddexp(n, 0.0), jax.nn.sigmoid(p)


if __name__ == "__main__":
    key = jax.random.PRNGKey(0)
    k_x, k_p, k_x2, k_p2 = jax.random.split(key, 4)

    # Small shape consistent with the module's forward.
    B, N, c_in, c_out = 2, 16, 4, 4
    x = jax.random.normal(k_x, (B, N, c_in, 1), jnp.float32)
    wn, bn, wp, bp = init_params(k_p, c_in, c_out)

    n_out, p_out = nbnorm_forward(x, wn, bn, wp, bp)
    n_out = jax.block_until_ready(n_out)
    p_out = jax.block_until_ready(p_out)

    n_ref, p_ref = nbnorm_reference(x, wn, bn, wp, bp)
    assert n_out.shape == (B, N, c_out) and p_out.shape == (B, N, c_out)
    assert jnp.allclose(n_out, n_ref, atol=1e-5, rtol=1e-5)
    assert jnp.allclose(p_out, p_ref, atol=1e-5, rtol=1e-5)

    # Second case: multi-tile grid + ragged edge (M % S != 0, M % TG != 0).
    B2, N2, c_in2, c_out2 = 3, 100, 8, 4
    x2 = jax.random.normal(k_x2, (B2, N2, c_in2, 1), jnp.float32)
    wn2, bn2, wp2, bp2 = init_params(k_p2, c_in2, c_out2)
    n2, p2 = nbnorm_forward(x2, wn2, bn2, wp2, bp2, tm=256)
    n2 = jax.block_until_ready(n2)
    p2 = jax.block_until_ready(p2)
    n2_ref, p2_ref = nbnorm_reference(x2, wn2, bn2, wp2, bp2)
    assert jnp.allclose(n2, n2_ref, atol=1e-5, rtol=1e-5)
    assert jnp.allclose(p2, p2_ref, atol=1e-5, rtol=1e-5)

    print("KERNEL_OK")
</pallas_src>

<mosaic_0001>
module attributes {stable_mosaic.version = 11 : i64} {
  func.func @nbnorm_kernel(%arg0: i32, %arg1: memref<1x128xf32, #tpu.memory_space<vmem>>, %arg2: memref<128x256xf32, #tpu.memory_space<vmem>>, %arg3: memref<1x256xf32, #tpu.memory_space<vmem>>, %arg4: memref<1x128xf32, #tpu.memory_space<vmem>>, %arg5: memref<1x128xf32, #tpu.memory_space<vmem>>) attributes {dimension_semantics = [#tpu.dimension_semantics<parallel>], iteration_bounds = array<i64: 1>, scalar_prefetch = 0 : i64, scratch_operands = 0 : i64, tpu.core_type = #tpu.core_type<tc>, window_params = [{transform_indices = @transform_0, window_bounds = array<i64: 1, 128>}, {pipeline_mode = #tpu.pipeline_mode<synchronous>, transform_indices = @transform_1, window_bounds = array<i64: 128, 256>}, {pipeline_mode = #tpu.pipeline_mode<synchronous>, transform_indices = @transform_2, window_bounds = array<i64: 1, 256>}, {transform_indices = @transform_3, window_bounds = array<i64: 1, 128>}, {transform_indices = @transform_4, window_bounds = array<i64: 1, 128>}]} {
    %c0 = arith.constant 0 : index
    %c0_0 = arith.constant 0 : index
    %0 = vector.load %arg1[%c0, %c0_0] : memref<1x128xf32, #tpu.memory_space<vmem>>, vector<1x128xf32>
    %c0_1 = arith.constant 0 : index
    %c0_2 = arith.constant 0 : index
    %1 = vector.load %arg2[%c0_1, %c0_2] : memref<128x256xf32, #tpu.memory_space<vmem>>, vector<128x256xf32>
    %cst = arith.constant dense<0.000000e+00> : vector<1x256xf32>
    %2 = tpu.matmul %0, %1, %cst {dimension_numbers = #tpu.dot_dimension_numbers<[1], [0], [0], [1], [0, 0, 1, 1], [], []>} : vector<1x128xf32>, vector<128x256xf32>, vector<1x256xf32> -> vector<1x256xf32>
    %c0_3 = arith.constant 0 : index
    %c0_4 = arith.constant 0 : index
    %3 = vector.load %arg3[%c0_3, %c0_4] : memref<1x256xf32, #tpu.memory_space<vmem>>, vector<1x256xf32>
    %4 = arith.addf %2, %3 : vector<1x256xf32>
    %5 = vector.extract_strided_slice %4 {offsets = [0, 0], sizes = [1, 128], strides = [1, 1]} : vector<1x256xf32> to vector<1x128xf32>
    %6 = vector.extract_strided_slice %4 {offsets = [0, 128], sizes = [1, 128], strides = [1, 1]} : vector<1x256xf32> to vector<1x128xf32>
    %cst_5 = arith.constant 0.000000e+00 : f32
    %7 = vector.broadcast %cst_5 : f32 to vector<1x128xf32>
    %8 = arith.maximumf %5, %7 : vector<1x128xf32>
    %9 = math.absf %5 : vector<1x128xf32>
    %cst_6 = arith.constant 0.000000e+00 : f32
    %10 = vector.broadcast %cst_6 : f32 to vector<1x128xf32>
    %11 = arith.subf %10, %9 : vector<1x128xf32>
    %12 = math.exp %11 : vector<1x128xf32>
    %cst_7 = arith.constant 1.000000e+00 : f32
    %13 = vector.broadcast %cst_7 : f32 to vector<1x128xf32>
    %14 = arith.addf %13, %12 : vector<1x128xf32>
    %15 = math.log %14 : vector<1x128xf32>
    %16 = arith.addf %8, %15 : vector<1x128xf32>
    %c0_8 = arith.constant 0 : index
    %c0_9 = arith.constant 0 : index
    %17 = vector.load %arg4[%c0_8, %c0_9] : memref<1x128xf32, #tpu.memory_space<vmem>>, vector<1x128xf32>
    tpu.vector_store %arg4[%c0_8, %c0_9], %16 {strides = array<i32>} : memref<1x128xf32, #tpu.memory_space<vmem>>, vector<1x128xf32>,
    %cst_10 = arith.constant 5.000000e-01 : f32
    %18 = vector.broadcast %cst_10 : f32 to vector<1x128xf32>
    %19 = arith.mulf %18, %6 : vector<1x128xf32>
    %20 = math.tanh %19 : vector<1x128xf32>
    %cst_11 = arith.constant 5.000000e-01 : f32
    %21 = vector.broadcast %cst_11 : f32 to vector<1x128xf32>
    %22 = arith.mulf %21, %20 : vector<1x128xf32>
    %cst_12 = arith.constant 5.000000e-01 : f32
    %23 = vector.broadcast %cst_12 : f32 to vector<1x128xf32>
    %24 = arith.addf %22, %23 : vector<1x128xf32>
    %c0_13 = arith.constant 0 : index
    %c0_14 = arith.constant 0 : index
    %25 = vector.load %arg5[%c0_13, %c0_14] : memref<1x128xf32, #tpu.memory_space<vmem>>, vector<1x128xf32>
    tpu.vector_store %arg5[%c0_13, %c0_14], %24 {strides = array<i32>} : memref<1x128xf32, #tpu.memory_space<vmem>>, vector<1x128xf32>,
    return
  }
  func.func @transform_0(%arg0: i32) -> (i32, i32) {
    %c0_i32 = arith.constant 0 : i32
    %c0_i32_0 = arith.constant 0 : i32
    return %arg0, %c0_i32 : i32, i32
  }
  func.func @transform_1(%arg0: i32) -> (i32, i32) {
    %c0_i32 = arith.constant 0 : i32
    %c0_i32_0 = arith.constant 0 : i32
    %c0_i32_1 = arith.constant 0 : i32
    return %c0_i32, %c0_i32_0 : i32, i32
  }
  func.func @transform_2(%arg0: i32) -> (i32, i32) {
    %c0_i32 = arith.constant 0 : i32
    %c0_i32_0 = arith.constant 0 : i32
    %c0_i32_1 = arith.constant 0 : i32
    return %c0_i32, %c0_i32_0 : i32, i32
  }
  func.func @transform_3(%arg0: i32) -> (i32, i32) {
    %c0_i32 = arith.constant 0 : i32
    %c0_i32_0 = arith.constant 0 : i32
    return %arg0, %c0_i32 : i32, i32
  }
  func.func @transform_4(%arg0: i32) -> (i32, i32) {
    %c0_i32 = arith.constant 0 : i32
    %c0_i32_0 = arith.constant 0 : i32
    return %arg0, %c0_i32 : i32, i32
  }
}

</mosaic_0001>

<bundles_post_ra>
// kernel: tpu_custom_call.1
= control target key start
LH: loop header
LB: loop body
LE: loop exit
PB: predicated region body
PF: predicated region fallthrough
CT: control target
= control target key end

     0   :  { %10 = vsyncpa [#allocation3], 0  ;;  %s436_s0 = inlined_call_operand.hbm [shape: f32[1,128], index: 0, kind: input, shape index: {}]   ;;  %s437_s1 = inlined_call_operand.hbm [shape: f32[128,256], index: 1, kind: input, shape index: {}]   ;;  %s438_s2 = inlined_call_operand.vmem [shape: f32[1,256], index: 2, kind: input, shape index: {}]   ;;  %s439_s3 = inlined_call_operand.hbm [shape: f32[1,128], index: 3, kind: output, shape index: {0}]   ;;  %s440_s4 = inlined_call_operand.hbm [shape: f32[1,128], index: 4, kind: output, shape index: {1}]  }
   0x1   :  { %11 = vsyncpa [#allocation6], 0 }
   0x2   :  { %12 = vsyncpa [#allocation4], 0 }
   0x3   :  { %13 = vsyncpa [#allocation9], 0  ;;  %s346_s15 = smov [#allocation2]   ;;  %s347_s17 = smov [#allocation5]  }
   0x4   :  { %s20_s16 = sshll.u32 %s346_s15, 4  ;;  %s29_s18 = sshll.u32 %s347_s17, 4  ;;  %s21_s16 = int_to_ptr.vmem [resolvable:$true] %s20_s16  ;;  %s378_s18 = int_to_ptr.vmem [resolvable:$true] %s29_s18 }
   0x5   :  { %s250_s21 = scalar_lea.hbm %s436_s0, 16 }
   0x6   :  { %p251_p0 = scmp.ne.s32.totalorder %s436_s0, %s250_s21  ;;  %p254_p1 = scmp.lt.u32.totalorder %s250_s21, %s436_s0 }
   0x8   :  { %p256_p2 = pnand %p254_p1, %p251_p0 }
   0xa   :  { %259 = shalt.err (!%p256_p2)
}
   0xb   :  { %s260_s26 = scalar_lea.vmem %s21_s16, 16  ;;  %s264_s27 = scalar_lea.vmem %s21_s16, 32 }
   0xc   :  { %p261_p3 = scmp.ne.s32.totalorder %s21_s16, %s260_s26  ;;  %p265_p4 = scmp.lt.s32.totalorder %s21_s16, %s21_s16 }
   0xd   :  { %p266_p5 = scmp.lt.s32.totalorder %s264_s27, %s260_s26 }
   0xf   :  { %p267_p6 = por %p266_p5, %p265_p4 }
  0x11   :  { %p268_p7 = pnand %p267_p6, %p261_p3 }
  0x13   :  { %271 = shalt.err (!%p268_p7)
}
  0x14   :  { %23 = dma.hbm_to_vmem [thread:$0]  %s436_s0, 16, %s21_s16, [#allocation3]  }
  0x15   :  { %s272_s6 = scalar_lea.hbm %s437_s1, 4096 }
  0x16   :  { %p273_p8 = scmp.ne.s32.totalorder %s437_s1, %s272_s6  ;;  %p276_p9 = scmp.lt.u32.totalorder %s272_s6, %s437_s1 }
  0x18   :  { %p278_p10 = pnand %p276_p9, %p273_p8 }
  0x1a   :  { %281 = shalt.err (!%p278_p10)
}
  0x1b   :  { %s282_s11 = scalar_lea.vmem %s378_s18, 4096  ;;  %p287_p12 = scmp.lt.s32.totalorder %s378_s18, %s378_s18 }
  0x1c   :  { %p283_p11 = scmp.ne.s32.totalorder %s378_s18, %s282_s11  ;;  %p288_p13 = scmp.lt.s32.totalorder %s282_s11, %s282_s11 }
  0x1e   :  { %p289_p0 = por %p288_p13, %p287_p12 }
  0x20   :  { %p290_p1 = pnand %p289_p0, %p283_p11 }
  0x22   :  { %293 = shalt.err (!%p290_p1)
}
  0x23   :  { %s348_s0 = smov 256   ;;  %s349_s12 = smov 16  }
  0x24   :  { %35 = dma.hbm_to_vmem [thread:$0]  %s437_s1, 4096, %s378_s18, [#allocation6], %s348_s0, %s348_s0, %s349_s12  }
  0x25   :  { %338 = dma.done.wait [#allocation3], 16  }
  0x26   :  { %339 = vsyncadd [#allocation3], 4294967280 }
  0x27   :  { %340 = dma.done.wait [#allocation6], 4096  }
  0x28   :  { %341 = vsyncadd [#allocation6], 4294963200  ;;  %v350_v0 = vmov 0.0   ;;  %v46_v1 = vld [vmem:[#allocation5 + $0x8] sm:$0xff]  ;;  %v48_v2 = vld [vmem:[#allocation5 + $0x18] sm:$0xff]  ;;  %v79_v50 = vlaneseq  ;;  %s351_s16 = smov [#allocation8]  }
  0x29   :  { %153 = vmatprep.mubr.f32.mxu0 %v350_v0  ;;  %v45_v3 = vld [vmem:[#allocation5] sm:$0xff]  ;;  %v205_v4 = vpack.c.bf16 %v48_v2, %v46_v1  ;;  %v47_v5 = vld [vmem:[#allocation5 + $0x10] sm:$0xff]  ;;  %v50_v6 = vld [vmem:[#allocation5 + $0x28] sm:$0xff]  ;;  %s191_s17 = sshll.u32 %s351_s16, 4  ;;  %s192_s17 = int_to_ptr.vmem [resolvable:$true] %s191_s17 }
  0x2a   :  { %v52_v7 = vld [vmem:[#allocation5 + $0x38] sm:$0xff]  ;;  %v207_v8 = vpack.c.bf16 %v47_v5, %v45_v3  ;;  %v49_v10 = vld [vmem:[#allocation5 + $0x20] sm:$0xff]  ;;  %v51_v11 = vld [vmem:[#allocation5 + $0x30] sm:$0xff]  ;;  %v80_v51 = vshrl.u32 %v79_v50, 7  ;;  %s298_s18 = scalar_lea.vmem %s192_s17, 32  ;;  %p299_p3 = scmp.lt.s32.totalorder %s192_s17, %s192_s17 }
  0x2b   :  { %v209_v9 = vpack.c.bf16 %v52_v7, %v50_v6  ;;  %v54_v12 = vld [vmem:[#allocation5 + $0x48] sm:$0xff]  ;;  %206 = vmatprep.subr.bf16.mxu0 %v205_v4  ;;  %v56_v13 = vld [vmem:[#allocation5 + $0x58] sm:$0xff]  ;;  %v211_v14 = vpack.c.bf16 %v51_v11, %v49_v10  ;;  %v53_v16 = vld [vmem:[#allocation5 + $0x40] sm:$0xff] }
  0x2c   :  { %208 = vmatpush1.bf16.msra.mxu0 %v207_v8  ;;  %v213_v15 = vpack.c.bf16 %v56_v13, %v54_v12  ;;  %v55_v17 = vld [vmem:[#allocation5 + $0x50] sm:$0xff]  ;;  %v58_v18 = vld [vmem:[#allocation5 + $0x68] sm:$0xff]  ;;  %v60_v19 = vld [vmem:[#allocation5 + $0x78] sm:$0xff]  ;;  %v81_v52 = vsub.s32 0, %v80_v51  ;;  %v85_v54 = vsub.s32 1, %v80_v51 }
  0x2d   :  { %210 = vmatprep.subr.bf16.mxu0 %v209_v9  ;;  %v215_v20 = vpack.c.bf16 %v55_v17, %v53_v16  ;;  %v217_v21 = vpack.c.bf16 %v60_v19, %v58_v18  ;;  %v57_v22 = vld [vmem:[#allocation5 + $0x60] sm:$0xff]  ;;  %v59_v23 = vld [vmem:[#allocation5 + $0x70] sm:$0xff]  ;;  %v62_v24 = vld [vmem:[#allocation5 + $0x88] sm:$0xff] }
  0x2e   :  { %v64_v25 = vld [vmem:[#allocation5 + $0x98] sm:$0xff]  ;;  %v219_v26 = vpack.c.bf16 %v59_v23, %v57_v22  ;;  %v61_v28 = vld [vmem:[#allocation5 + $0x80] sm:$0xff]  ;;  %v63_v29 = vld [vmem:[#allocation5 + $0x90] sm:$0xff] }
  0x2f   :  { %v221_v27 = vpack.c.bf16 %v64_v25, %v62_v24  ;;  %v66_v30 = vld [vmem:[#allocation5 + $0xa8] sm:$0xff]  ;;  %v68_v31 = vld [vmem:[#allocation5 + $0xb8] sm:$0xff]  ;;  %v223_v32 = vpack.c.bf16 %v63_v29, %v61_v28  ;;  %v65_v34 = vld [vmem:[#allocation5 + $0xa0] sm:$0xff] }
  0x30   :  { %212 = vmatpush1.bf16.msra.mxu0 %v211_v14  ;;  %v225_v33 = vpack.c.bf16 %v68_v31, %v66_v30  ;;  %v67_v35 = vld [vmem:[#allocation5 + $0xb0] sm:$0xff]  ;;  %v70_v36 = vld [vmem:[#allocation5 + $0xc8] sm:$0xff]  ;;  %v72_v37 = vld [vmem:[#allocation5 + $0xd8] sm:$0xff] }
  0x31   :  { %214 = vmatprep.subr.bf16.mxu0 %v213_v15  ;;  %v227_v38 = vpack.c.bf16 %v67_v35, %v65_v34  ;;  %v229_v39 = vpack.c.bf16 %v72_v37, %v70_v36  ;;  %v69_v40 = vld [vmem:[#allocation5 + $0xc0] sm:$0xff]  ;;  %v71_v41 = vld [vmem:[#allocation5 + $0xd0] sm:$0xff]  ;;  %v74_v42 = vld [vmem:[#allocation5 + $0xe8] sm:$0xff] }
  0x32   :  { %v76_v43 = vld [vmem:[#allocation5 + $0xf8] sm:$0xff]  ;;  %v231_v44 = vpack.c.bf16 %v71_v41, %v69_v40  ;;  %v73_v46 = vld [vmem:[#allocation5 + $0xe0] sm:$0xff]  ;;  %v75_v47 = vld [vmem:[#allocation5 + $0xf0] sm:$0xff] }
  0x33   :  { %v233_v45 = vpack.c.bf16 %v76_v43, %v74_v42  ;;  %v235_v48 = vpack.c.bf16 %v75_v47, %v73_v46  ;;  %v44_v49 = vld [vmem:[#allocation2] sm:$0x1]  ;;  %v77_v53 = vld [vmem:[%s438_s2] sm:$0x3]  ;;  %s294_s2 = scalar_lea.vmem %s192_s17, 16 }
  0x34   :  { %216 = vmatpush1.bf16.msra.mxu0 %v215_v20  ;;  %v82_v55 = vrot.slane %v77_v53, %v81_v52  ;;  %v86_v56 = vrot.slane %v77_v53, %v85_v54  ;;  %p295_p2 = scmp.ne.s32.totalorder %s192_s17, %s294_s2  ;;  %p300_p4 = scmp.lt.s32.totalorder %s298_s18, %s294_s2 }
  0x35   :  { %218 = vmatprep.subr.bf16.mxu0 %v217_v21 }
  0x36   :  { %p301_p5 = por %p300_p4, %p299_p3 }
  0x38   :  { %220 = vmatpush1.bf16.msra.mxu0 %v219_v26  ;;  %p302_p6 = pnand %p301_p5, %p295_p2 }
  0x39   :  { %222 = vmatprep.subr.bf16.mxu0 %v221_v27 }
  0x3c   :  { %224 = vmatpush1.bf16.msra.mxu0 %v223_v32 }
  0x3d   :  { %226 = vmatprep.subr.bf16.mxu0 %v225_v33 }
  0x40   :  { %228 = vmatpush1.bf16.msra.mxu0 %v227_v38 }
  0x41   :  { %230 = vmatprep.subr.bf16.mxu0 %v229_v39 }
  0x44   :  { %232 = vmatpush1.bf16.msra.mxu0 %v231_v44 }
  0x45   :  { %234 = vmatprep.subr.bf16.mxu0 %v233_v45 }
  0x48   :  { %236 = vmatpush1.bf16.msra.mxu0 %v235_v48 }
  0x4b   :  { %154 = vmatmul.mubr.f32.vlgmr.msra.gmra.mrb[0].mxu0 %v44_v49 }
 0x11e   :  { %v155_v57 = vpop.f32.mrb[0].mxu0 }
 0x11f   :  { %v156_v58 = vadd.f32 %v155_v57, %v82_v55  ;;  %v157_v59 = vpop.f32.mrb[1].mxu0 }
 0x120   :  { %v158_v60 = vadd.f32 %v157_v59, %v86_v56 }
 0x121   :  { %v161_v61 = vand.u32 2147483647, %v156_v58 }
 0x122   :  { %v170_v62 = vmul.f32 0.5, %v158_v60 }
 0x123   :  { %v162_v63 = vsub.f32 0.0, %v161_v61 }
 0x124   :  { %244 = vtanh.f32 %v170_v62 }
 0x125   :  { %v163_v0 = vmul.f32 1.442695, %v162_v63 }
 0x127   :  { %246 = vpow2.f32 %v163_v0 }
 0x12e   :  { %v245_v1 = vpop.eup %244 }
 0x12f   :  { %v172_v2 = vmul.f32 0.5, %v245_v1 }
 0x131   :  { %v247_v3 = vpop.eup %246  ;;  %v173_v4 = vadd.f32 0.5, %v172_v2 }
 0x132   :  { %v165_v5 = vadd.f32 1.0, %v247_v3 }
 0x133   :  { %174 = vst [vmem:[#allocation8] sm:$0x1] %v173_v4 }
 0x134   :  { %248 = vlog2.f32 %v165_v5 }
 0x135   :  { %305 = shalt.err (!%p302_p6)
}
 0x136   :  { %s306_s21 = scalar_lea.hbm %s440_s4, 16 }
 0x137   :  { %p307_p7 = scmp.ne.s32.totalorder %s440_s4, %s306_s21  ;;  %p310_p8 = scmp.lt.u32.totalorder %s306_s21, %s440_s4 }
 0x139   :  { %p312_p9 = pnand %p310_p8, %p307_p7 }
 0x13b   :  { %315 = shalt.err (!%p312_p9)
}
 0x13c   :  { %194 = dma.vmem_to_hbm [thread:$0]  %s192_s17, 16, %s440_s4, [#allocation9]   ;;  %v160_v7 = vmax.f32 %v156_v58, 0.0 }
 0x13d   :  { %s352_s28 = smov [#allocation7]  }
 0x13e   :  { %v249_v6 = vpop.eup %248  ;;  %s181_s29 = sshll.u32 %s352_s28, 4  ;;  %s182_s29 = int_to_ptr.vmem [resolvable:$true] %s181_s29 }
 0x13f   :  { %v167_v8 = vmul.f32 0.6931472, %v249_v6  ;;  %s316_s30 = scalar_lea.vmem %s182_s29, 16  ;;  %s320_s5 = scalar_lea.vmem %s182_s29, 32 }
 0x140   :  { %p317_p10 = scmp.ne.s32.totalorder %s182_s29, %s316_s30  ;;  %p321_p11 = scmp.lt.s32.totalorder %s182_s29, %s182_s29 }
 0x141   :  { %v168_v9 = vadd.f32 %v167_v8, %v160_v7  ;;  %p322_p12 = scmp.lt.s32.totalorder %s320_s5, %s316_s30 }
 0x143   :  { %169 = vst [vmem:[#allocation7] sm:$0x1] %v168_v9  ;;  %p323_p13 = por %p322_p12, %p321_p11 }
 0x145   :  { %p324_p0 = pnand %p323_p13, %p317_p10 }
 0x147   :  { %327 = shalt.err (!%p324_p0)
}
 0x148   :  { %s328_s4 = scalar_lea.hbm %s439_s3, 16 }
 0x149   :  { %p329_p1 = scmp.ne.s32.totalorder %s439_s3, %s328_s4  ;;  %p332_p2 = scmp.lt.u32.totalorder %s328_s4, %s439_s3 }
 0x14b   :  { %p334_p3 = pnand %p332_p2, %p329_p1 }
 0x14d   :  { %337 = shalt.err (!%p334_p3)
}
 0x14e   :  { %184 = dma.vmem_to_hbm [thread:$0]  %s182_s29, 16, %s439_s3, [#allocation4]  }
 0x14f   :  { %342 = dma.done.wait [#allocation4], 16  }
 0x150   :  { %343 = vsyncadd [#allocation4], 4294967280 }
 0x151   :  { %344 = dma.done.wait [#allocation9], 16  }
 0x152   :  { %345 = vsyncadd [#allocation9], 4294967280 }
 0x153   :  { %201 = vsyncpa [#allocation3], 1 }
 0x154   :  { %202 = vsyncpa [#allocation6], 1 }
 0x155   :  { %203 = vsyncpa [#allocation4], 1 }
 0x156   :  { %204 = vsyncpa [#allocation9], 1 }

</bundles_post_ra>
